<compile_context>
chip_gen: v6e
topology: v6e:2x2x1
jax: 0.10.0
libtpu: 0.0.40
codegen_flags: <defaults>
</compile_context>

<pallas_src>
import functools

import jax
import jax.numpy as jnp
import numpy as np
from jax.experimental import pallas as pl
from jax.experimental.pallas import tpu as pltpu

LANE = 128
SUBLANE = 8
IN_FEATURES = 784


def _round_up(x, m):
    return (x + m - 1) // m * m


def _log_softmax_masked(h, n_valid):
    """log_softmax over the last dim, ignoring padded lanes >= n_valid."""
    lane = jax.lax.broadcasted_iota(jnp.int32, h.shape, dimension=h.ndim - 1)
    valid = lane < n_valid
    hm = jnp.where(valid, h, -jnp.inf)
    m = jnp.max(hm, axis=-1, keepdims=True)
    e = jnp.where(valid, jnp.exp(hm - m), 0.0)
    s = jnp.sum(e, axis=-1, keepdims=True)
    return hm - m - jnp.log(s)


def _mlp1_kernel(x_ref, w1_ref, b1_ref, o_ref, *, use_relu, use_softmax, n1):
    # (tile_B, 784) f32 -> bf16 in-register, one MXU dot per batch tile.
    xb = x_ref[...].astype(jnp.bfloat16)
    h = jnp.dot(xb, w1_ref[...], preferred_element_type=jnp.float32)
    h = h + b1_ref[...]
    if use_relu:
        h = jnp.maximum(h, 0.0)
    if use_softmax:
        h = _log_softmax_masked(h, n1)
    o_ref[...] = h.astype(o_ref.dtype)


def _mlp2_kernel(x_ref, w1_ref, b1_ref, w2_ref, b2_ref, o_ref, *,
                 use_relu, use_softmax, n2):
    # Fused fc1 -> [relu] -> fc2 -> [relu] -> [log_softmax]; the inter-layer
    # activation never touches HBM.  Second dot stays in f32 (tiny, hidden
    # under the HBM bound).
    xb = x_ref[...].astype(jnp.bfloat16)
    h = jnp.dot(xb, w1_ref[...], preferred_element_type=jnp.float32)
    h = h + b1_ref[...]
    if use_relu:
        h = jnp.maximum(h, 0.0)
    # Padded hidden lanes are exactly 0 (zero weight cols + zero bias) and the
    # matching rows of w2 are zero, so the padding never leaks into fc2.
    y = jnp.dot(h, w2_ref[...], preferred_element_type=jnp.float32)
    y = y + b2_ref[...]
    if use_relu:
        y = jnp.maximum(y, 0.0)
    if use_softmax:
        y = _log_softmax_masked(y, n2)
    o_ref[...] = y.astype(o_ref.dtype)


def _pad_weight(w, k_pad, n_pad, dtype):
    """PyTorch (out, in) f32 weight -> pre-transposed (k_pad, n_pad) `dtype`."""
    out_f, in_f = w.shape
    wt = jnp.zeros((k_pad, n_pad), jnp.float32)
    wt = wt.at[:in_f, :out_f].set(jnp.asarray(w, jnp.float32).T)
    return wt.astype(dtype)


def _pad_bias(b, n_pad):
    out_f = b.shape[0]
    bp = jnp.zeros((1, n_pad), jnp.float32)
    return bp.at[0, :out_f].set(jnp.asarray(b, jnp.float32))


def prepare_linear_net1_params(params, *, test_num=0):
    """One-time (load-time) weight prep: transpose, pad to 128 lanes, cast.

    Hoisted out of the forward so it is not re-done on every call of a
    microsecond-scale kernel.
    """
    n1_valid = params["w1"].shape[0]
    n1_pad = _round_up(n1_valid, LANE)
    prep = {
        "n1_valid": n1_valid,
        "n1_pad": n1_pad,
        # fc1 weight in bf16 (first dot runs bf16 on the MXU).
        "w1": _pad_weight(params["w1"], IN_FEATURES, n1_pad, jnp.bfloat16),
        "b1": _pad_bias(params["b1"], n1_pad),
    }
    if test_num == 1:
        n2_valid = params["w2"].shape[0]
        n2_pad = _round_up(n2_valid, LANE)
        prep.update({
            "n2_valid": n2_valid,
            "n2_pad": n2_pad,
            # fc2 weight kept in f32 (tiny matmul, precision for free).
            "w2": _pad_weight(params["w2"], n1_pad, n2_pad, jnp.float32),
            "b2": _pad_bias(params["b2"], n2_pad),
        })
    return prep


def _pick_tile_b(B):
    # Small batches: a single full-extent block (satisfies the (8,128) rule
    # because it equals the full array dim).  Larger batches: at least two
    # grid steps so v7x's second TensorCore gets a share of the
    # bandwidth-bound work, capped at 1024 rows for VMEM headroom everywhere.
    if B <= SUBLANE:
        return B
    return min(1024, _round_up(pl.cdiv(B, 2), SUBLANE))


def linear_net1_forward(x, prepared, *, test_num=0, use_relu=False,
                        use_softmax=False):
    """Pallas TPU forward for LinearNet1.test0 / test1.

    x: (B, C, H, W) with C*H*W == 784 (e.g. (B, 1, 28, 28)), any float dtype.
    prepared: output of prepare_linear_net1_params(...).
    """
    B = x.shape[0]
    xf = x.reshape(B, -1)
    assert xf.shape[1] == IN_FEATURES, "flattened input must be 784 features"
    if xf.dtype != jnp.float32:
        xf = xf.astype(jnp.float32)

    n1_pad = prepared["n1_pad"]
    n1_valid = prepared["n1_valid"]
    w1, b1 = prepared["w1"], prepared["b1"]

    tile_b = _pick_tile_b(B)
    grid = (pl.cdiv(B, tile_b),)
    x_spec = pl.BlockSpec((tile_b, IN_FEATURES), lambda i: (i, 0))
    cparams = pltpu.CompilerParams(dimension_semantics=("parallel",))

    if test_num == 0:
        kernel = functools.partial(_mlp1_kernel, use_relu=use_relu,
                                   use_softmax=use_softmax, n1=n1_valid)
        cost = pl.CostEstimate(
            flops=2 * B * IN_FEATURES * n1_pad,
            transcendentals=B * n1_pad if use_softmax else 0,
            bytes_accessed=(B * IN_FEATURES * 4 + IN_FEATURES * n1_pad * 2
                            + n1_pad * 4 + B * n1_pad * 4),
        )
        out = pl.pallas_call(
            kernel,
            out_shape=jax.ShapeDtypeStruct((B, n1_pad), jnp.float32),
            grid=grid,
            in_specs=[
                x_spec,
                pl.BlockSpec((IN_FEATURES, n1_pad), lambda i: (0, 0)),  # resident
                pl.BlockSpec((1, n1_pad), lambda i: (0, 0)),            # resident
            ],
            out_specs=pl.BlockSpec((tile_b, n1_pad), lambda i: (i, 0)),
            compiler_params=cparams,
            cost_estimate=cost,
        )(xf, w1, b1)
        return out[:, :n1_valid]

    elif test_num == 1:
        n2_pad = prepared["n2_pad"]
        n2_valid = prepared["n2_valid"]
        w2, b2 = prepared["w2"], prepared["b2"]
        kernel = functools.partial(_mlp2_kernel, use_relu=use_relu,
                                   use_softmax=use_softmax, n2=n2_valid)
        cost = pl.CostEstimate(
            flops=2 * B * IN_FEATURES * n1_pad + 2 * B * n1_pad * n2_pad,
            transcendentals=B * n2_pad if use_softmax else 0,
            bytes_accessed=(B * IN_FEATURES * 4 + IN_FEATURES * n1_pad * 2
                            + n1_pad * 4 + n1_pad * n2_pad * 4 + n2_pad * 4
                            + B * n2_pad * 4),
        )
        out = pl.pallas_call(
            kernel,
            out_shape=jax.ShapeDtypeStruct((B, n2_pad), jnp.float32),
            grid=grid,
            in_specs=[
                x_spec,
                pl.BlockSpec((IN_FEATURES, n1_pad), lambda i: (0, 0)),
                pl.BlockSpec((1, n1_pad), lambda i: (0, 0)),
                pl.BlockSpec((n1_pad, n2_pad), lambda i: (0, 0)),
                pl.BlockSpec((1, n2_pad), lambda i: (0, 0)),
            ],
            out_specs=pl.BlockSpec((tile_b, n2_pad), lambda i: (i, 0)),
            compiler_params=cparams,
            cost_estimate=cost,
        )(xf, w1, b1, w2, b2)
        return out[:, :n2_valid]

    else:
        # TODO(synk): test_num == 2 constructs fresh nn.Linear modules inside
        # forward and assigns the module object (not its output) to x — the
        # PyTorch reference is broken / has undefined semantics, so it is not
        # translated.
        raise NotImplementedError("test_num must be 0 or 1")


def _reference_forward(x, params, *, test_num, use_relu, use_softmax):
    """Pure-JAX f32 replica of the PyTorch forward for verification."""
    B = x.shape[0]
    h = x.reshape(B, -1).astype(jnp.float32)
    h = h @ params["w1"].T + params["b1"]
    if use_relu:
        h = jnp.maximum(h, 0.0)
    if test_num == 1:
        h = h @ params["w2"].T + params["b2"]
        if use_relu:
            h = jnp.maximum(h, 0.0)
    if use_softmax:
        h = jax.nn.log_softmax(h, axis=-1)
    return h


if __name__ == "__main__":
    key = jax.random.PRNGKey(0)
    kx, k1, k2, k3, k4 = jax.random.split(key, 5)

    B = 2
    x = jax.random.normal(kx, (B, 1, 28, 28), jnp.float32)

    hidden = 2  # two_layers_neuron_count (default)
    bound1 = 1.0 / np.sqrt(IN_FEATURES)
    bound2 = 1.0 / np.sqrt(hidden)
    params = {
        "w1": jax.random.uniform(k1, (hidden, IN_FEATURES), jnp.float32,
                                 -bound1, bound1),
        "b1": jax.random.uniform(k2, (hidden,), jnp.float32, -bound1, bound1),
        "w2": jax.random.uniform(k3, (10, hidden), jnp.float32,
                                 -bound2, bound2),
        "b2": jax.random.uniform(k4, (10,), jnp.float32, -bound2, bound2),
    }

    # One-time (load-time) weight prep, reused across forward calls.
    prep0 = prepare_linear_net1_params(params, test_num=0)
    prep1 = prepare_linear_net1_params(params, test_num=1)

    # Default module config: test_num=0, no relu / softmax (flatten -> fc1).
    y0 = linear_net1_forward(x, prep0, test_num=0,
                             use_relu=False, use_softmax=False)
    jax.block_until_ready(y0)
    r0 = _reference_forward(x, params, test_num=0,
                            use_relu=False, use_softmax=False)
    np.testing.assert_allclose(np.asarray(y0), np.asarray(r0),
                               rtol=5e-2, atol=5e-2)

    # Fused two-layer config: test_num=1 with relu + log_softmax.
    y1 = linear_net1_forward(x, prep1, test_num=1,
                             use_relu=True, use_softmax=True)
    jax.block_until_ready(y1)
    r1 = _reference_forward(x, params, test_num=1,
                            use_relu=True, use_softmax=True)
    np.testing.assert_allclose(np.asarray(y1), np.asarray(r1),
                               rtol=5e-2, atol=5e-2)

    print("KERNEL_OK")
</pallas_src>

<mosaic_0001>
module attributes {stable_mosaic.version = 11 : i64} {
  func.func @_mlp1_kernel(%arg0: i32, %arg1: memref<2x784xf32, #tpu.memory_space<vmem>>, %arg2: memref<784x128xbf16, #tpu.memory_space<vmem>>, %arg3: memref<1x128xf32, #tpu.memory_space<vmem>>, %arg4: memref<2x128xf32, #tpu.memory_space<vmem>>) attributes {dimension_semantics = [#tpu.dimension_semantics<parallel>], iteration_bounds = array<i64: 1>, scalar_prefetch = 0 : i64, scratch_operands = 0 : i64, tpu.core_type = #tpu.core_type<tc>, window_params = [{transform_indices = @transform_0, window_bounds = array<i64: 2, 784>}, {pipeline_mode = #tpu.pipeline_mode<synchronous>, transform_indices = @transform_1, window_bounds = array<i64: 784, 128>}, {pipeline_mode = #tpu.pipeline_mode<synchronous>, transform_indices = @transform_2, window_bounds = array<i64: 1, 128>}, {transform_indices = @transform_3, window_bounds = array<i64: 2, 128>}]} {
    %c0 = arith.constant 0 : index
    %c0_0 = arith.constant 0 : index
    %0 = vector.load %arg1[%c0, %c0_0] : memref<2x784xf32, #tpu.memory_space<vmem>>, vector<2x784xf32>
    %1 = arith.truncf %0 : vector<2x784xf32> to vector<2x784xbf16>
    %c0_1 = arith.constant 0 : index
    %c0_2 = arith.constant 0 : index
    %2 = vector.load %arg2[%c0_1, %c0_2] : memref<784x128xbf16, #tpu.memory_space<vmem>>, vector<784x128xbf16>
    %cst = arith.constant dense<0.000000e+00> : vector<2x128xf32>
    %3 = tpu.matmul %1, %2, %cst {dimension_numbers = #tpu.dot_dimension_numbers<[1], [0], [0], [1], [0, 0, 1, 1], [], []>} : vector<2x784xbf16>, vector<784x128xbf16>, vector<2x128xf32> -> vector<2x128xf32>
    %c0_3 = arith.constant 0 : index
    %c0_4 = arith.constant 0 : index
    %4 = vector.load %arg3[%c0_3, %c0_4] : memref<1x128xf32, #tpu.memory_space<vmem>>, vector<1x128xf32>
    %5 = vector.broadcast %4 : vector<1x128xf32> to vector<2x128xf32>
    %6 = arith.addf %3, %5 : vector<2x128xf32>
    %c0_5 = arith.constant 0 : index
    %c0_6 = arith.constant 0 : index
    %7 = vector.load %arg4[%c0_5, %c0_6] : memref<2x128xf32, #tpu.memory_space<vmem>>, vector<2x128xf32>
    tpu.vector_store %arg4[%c0_5, %c0_6], %6 {strides = array<i32>} : memref<2x128xf32, #tpu.memory_space<vmem>>, vector<2x128xf32>,
    return
  }
  func.func @transform_0(%arg0: i32) -> (i32, i32) {
    %c0_i32 = arith.constant 0 : i32
    %c0_i32_0 = arith.constant 0 : i32
    return %arg0, %c0_i32 : i32, i32
  }
  func.func @transform_1(%arg0: i32) -> (i32, i32) {
    %c0_i32 = arith.constant 0 : i32
    %c0_i32_0 = arith.constant 0 : i32
    %c0_i32_1 = arith.constant 0 : i32
    return %c0_i32, %c0_i32_0 : i32, i32
  }
  func.func @transform_2(%arg0: i32) -> (i32, i32) {
    %c0_i32 = arith.constant 0 : i32
    %c0_i32_0 = arith.constant 0 : i32
    %c0_i32_1 = arith.constant 0 : i32
    return %c0_i32, %c0_i32_0 : i32, i32
  }
  func.func @transform_3(%arg0: i32) -> (i32, i32) {
    %c0_i32 = arith.constant 0 : i32
    %c0_i32_0 = arith.constant 0 : i32
    return %arg0, %c0_i32 : i32, i32
  }
}

</mosaic_0001>

<bundles_post_ra>
// kernel: tpu_custom_call.1
= control target key start
LH: loop header
LB: loop body
LE: loop exit
PB: predicated region body
PF: predicated region fallthrough
CT: control target
= control target key end

     0   :  { %8 = vsyncpa [#allocation3], 0  ;;  %s963_s0 = inlined_call_operand.hbm [shape: f32[2,784], index: 0, kind: input, shape index: {}]   ;;  %s964_s1 = inlined_call_operand.hbm [shape: bf16[784,128], index: 1, kind: input, shape index: {}]   ;;  %s965_s2 = inlined_call_operand.vmem [shape: f32[1,128], index: 2, kind: input, shape index: {}]   ;;  %s966_s3 = inlined_call_operand.hbm [shape: f32[2,128], index: 3, kind: output, shape index: {}]  }
   0x1   :  { %9 = vsyncpa [#allocation6], 0 }
   0x2   :  { %10 = vsyncpa [#allocation4], 0  ;;  %s923_s12 = smov [#allocation2]   ;;  %s924_s14 = smov [#allocation5]  }
   0x3   :  { %s17_s13 = sshll.u32 %s923_s12, 4  ;;  %s26_s15 = sshll.u32 %s924_s14, 4  ;;  %s18_s13 = int_to_ptr.vmem [resolvable:$true] %s17_s13  ;;  %s27_s15 = int_to_ptr.vmem [resolvable:$true] %s26_s15 }
   0x4   :  { %s865_s16 = scalar_lea.vmem %s18_s13, 224  ;;  %p870_p1 = scmp.lt.s32.totalorder %s18_s13, %s18_s13 }
   0x5   :  { %p866_p0 = scmp.ne.s32.totalorder %s18_s13, %s865_s16  ;;  %p871_p2 = scmp.lt.s32.totalorder %s865_s16, %s865_s16 }
   0x7   :  { %p872_p3 = por %p871_p2, %p870_p1 }
   0x9   :  { %p873_p4 = pnand %p872_p3, %p866_p0 }
   0xb   :  { %876 = shalt.err (!%p873_p4)
}
   0xc   :  { %20 = dma.hbm_to_vmem [thread:$0]  %s963_s0, 224, %s18_s13, [#allocation3]  }
   0xd   :  { %s885_s19 = scalar_lea.vmem %s27_s15, 6272  ;;  %p890_p6 = scmp.lt.s32.totalorder %s27_s15, %s27_s15 }
   0xe   :  { %p886_p5 = scmp.ne.s32.totalorder %s27_s15, %s885_s19  ;;  %p891_p7 = scmp.lt.s32.totalorder %s885_s19, %s885_s19 }
  0x10   :  { %p892_p8 = por %p891_p7, %p890_p6 }
  0x12   :  { %p893_p9 = pnand %p892_p8, %p886_p5 }
  0x14   :  { %896 = shalt.err (!%p893_p9)
}
  0x15   :  { %s925_s20 = smov 64   ;;  %s926_s21 = smov 4  }
  0x16   :  { %32 = dma.hbm_to_vmem [thread:$0]  %s964_s1, 6272, %s27_s15, [#allocation6], %s925_s20, %s925_s20, %s926_s21  }
  0x17   :  { %917 = dma.done.wait [#allocation3], 224  }
  0x18   :  { %918 = vsyncadd [#allocation3], 4294967072 }
  0x19   :  { %919 = dma.done.wait [#allocation6], 6272  }
  0x1a   :  { %920 = vsyncadd [#allocation6], 4294961024  ;;  %v806_v0 = vld [vmem:[#allocation5 + $0x78] sm:$0xff]   ;;  %v810_v4 = vld [vmem:[#allocation5 + $0x70] sm:$0xff]   ;;  %v927_v21 = vmov 1983009808   ;;  %v50_v23 = vlaneseq }
  0x1b   :  { %v807_v1 = vld [vmem:[#allocation5 + $0x38] sm:$0xff]   ;;  %724 = vmatprep.subr.bf16.mxu0 %v806_v0  ;;  %v811_v5 = vld [vmem:[#allocation5 + $0x30] sm:$0xff]   ;;  %v814_v8 = vld [vmem:[#allocation5 + $0x68] sm:$0xff]   ;;  %v48_v22 = vunpack.c.l.s4 %v927_v21  ;;  %v928_v45 = vmov 0.0   ;;  %vm929_vm0 = vmmov 0   ;;  %vm492_vm1 = vcmask 130048  }
  0x1c   :  { %v808_v2 = vld [vmem:[#allocation5 + $0xf8] sm:$0xff]   ;;  %725 = vmatpush3.bf16.msra.mxu0 %v807_v1  ;;  %v812_v6 = vld [vmem:[#allocation5 + $0xf0] sm:$0xff]   ;;  %v815_v9 = vld [vmem:[#allocation5 + $0x28] sm:$0xff]   ;;  %v51_v29 = vshrl.u32 %v50_v23, 7  ;;  %s930_s24 = smov [#allocation7]  }
  0x1d   :  { %v809_v3 = vld [vmem:[#allocation5 + $0xb8] sm:$0xff]   ;;  %746 = vmatprep.subr.bf16.mxu1 %v808_v2  ;;  %726 = vmatprep.subr.bf16.mxu0 %v810_v4  ;;  %v813_v7 = vld [vmem:[#allocation5 + $0xb0] sm:$0xff]   ;;  %v816_v10 = vld [vmem:[#allocation5 + $0xe8] sm:$0xff]   ;;  %v49_v28 = vunpack.c.0.s8 %v48_v22  ;;  %s663_s25 = sshll.u32 %s930_s24, 4  ;;  %s664_s25 = int_to_ptr.vmem [resolvable:$true] %s663_s25 }
  0x1e   :  { %747 = vmatpush3.bf16.msra.mxu1 %v809_v3  ;;  %v817_v11 = vld [vmem:[#allocation5 + $0xa8] sm:$0xff]   ;;  %v818_v12 = vld [vmem:[#allocation5 + $0x60] sm:$0xff]   ;;  %v822_v16 = vld [vmem:[#allocation5 + $0x58] sm:$0xff]   ;;  %s897_s26 = scalar_lea.vmem %s664_s25, 32  ;;  %p902_p11 = scmp.lt.s32.totalorder %s664_s25, %s664_s25 }
  0x1f   :  { %748 = vmatprep.subr.bf16.mxu1 %v812_v6  ;;  %v819_v13 = vld [vmem:[#allocation5 + $0x20] sm:$0xff]   ;;  %v823_v17 = vld [vmem:[#allocation5 + $0x18] sm:$0xff]   ;;  %v826_v20 = vld [vmem:[#allocation5 + $0x50] sm:$0xff]   ;;  %v52_v34 = vsub.s32 %v49_v28, %v51_v29  ;;  %p898_p10 = scmp.ne.s32.totalorder %s664_s25, %s897_s26  ;;  %p903_p12 = scmp.lt.s32.totalorder %s897_s26, %s897_s26 }
  0x20   :  { %727 = vmatpush3.bf16.msra.mxu0 %v811_v5  ;;  %v820_v14 = vld [vmem:[#allocation5 + $0xe0] sm:$0xff]   ;;  %v824_v18 = vld [vmem:[#allocation5 + $0xd8] sm:$0xff]   ;;  %v827_v24 = vld [vmem:[#allocation5 + $0x10] sm:$0xff]  }
  0x21   :  { %728 = vmatprep.subr.bf16.mxu0 %v814_v8  ;;  %v821_v15 = vld [vmem:[#allocation5 + $0xa0] sm:$0xff]   ;;  %v825_v19 = vld [vmem:[#allocation5 + $0x98] sm:$0xff]   ;;  %v828_v25 = vld [vmem:[#allocation5 + $0xd0] sm:$0xff]   ;;  %p904_p13 = por %p903_p12, %p902_p11 }
  0x22   :  { %749 = vmatpush3.bf16.msra.mxu1 %v813_v7  ;;  %v829_v26 = vld [vmem:[#allocation5 + $0x90] sm:$0xff]   ;;  %v830_v27 = vld [vmem:[#allocation5 + $0x48] sm:$0xff]   ;;  %v834_v33 = vld [vmem:[#allocation5 + $0x40] sm:$0xff]  }
  0x23   :  { %750 = vmatprep.subr.bf16.mxu1 %v816_v10  ;;  %v831_v30 = vld [vmem:[#allocation5 + $0x8] sm:$0xff]   ;;  %v835_v35 = vld [vmem:[#allocation5] sm:$0xff]   ;;  %v42_v37 = vld [vmem:[#allocation2] sm:$0xff]  ;;  %p905_p0 = pnand %p904_p13, %p898_p10 }
  0x24   :  { %729 = vmatpush3.bf16.msra.mxu0 %v815_v9  ;;  %v832_v31 = vld [vmem:[#allocation5 + $0xc8] sm:$0xff]   ;;  %v836_v36 = vld [vmem:[#allocation5 + $0xc0] sm:$0xff]   ;;  %v53_v38 = vrot.slane %v42_v37, %v52_v34  ;;  %v46_v40 = vcombine.high %v42_v37, %v42_v37  ;;  %v838_v41 = vld [vmem:[#allocation5 + $0x178] sm:$0xff]  }
  0x25   :  { %730 = vmatprep.subr.bf16.mxu0 %v818_v12  ;;  %v833_v32 = vld [vmem:[#allocation5 + $0x88] sm:$0xff]   ;;  %v837_v39 = vld [vmem:[#allocation5 + $0x80] sm:$0xff]   ;;  %v840_v48 = vld [vmem:[#allocation5 + $0x138] sm:$0xff]  }
  0x26   :  { %751 = vmatpush3.bf16.msra.mxu1 %v817_v11  ;;  %v61_v42 = vcombine.high %v53_v38, %v53_v38  ;;  %v60_v43 = vrot.slane %v46_v40, %v52_v34  ;;  %v86_v44 = vpack.c.bf16 %v53_v38, %v53_v38  ;;  %v841_v50 = vld [vmem:[#allocation5 + $0x170] sm:$0xff]   ;;  %v843_v53 = vld [vmem:[#allocation5 + $0x168] sm:$0xff]   ;;  %v845_v55 = vld [vmem:[#allocation5 + $0x160] sm:$0xff]  }
  0x27   :  { %752 = vmatprep.subr.bf16.mxu1 %v820_v14  ;;  %v842_v52 = vld [vmem:[#allocation5 + $0x130] sm:$0xff]   ;;  %v844_v54 = vld [vmem:[#allocation5 + $0x128] sm:$0xff]   ;;  %v853_v56 = vld [vmem:[#allocation5 + $0x180] sm:$0xff]  }
  0x28   :  { %731 = vmatpush3.bf16.msra.mxu0 %v819_v13  ;;  %v87_v46 = vpack.c.bf16 %v61_v42, %v61_v42  ;;  %v62_v47 = vcombine.high %v60_v43, %v60_v43  ;;  %v88_v49 = vpack.c.bf16 %v60_v43, %v60_v43  ;;  %v846_v57 = vld [vmem:[#allocation5 + $0x120] sm:$0xff]   ;;  %v847_v58 = vld [vmem:[#allocation5 + $0x158] sm:$0xff]   ;;  %v849_v1 = vld [vmem:[#allocation5 + $0x150] sm:$0xff]  }
  0x29   :  { %732 = vmatprep.subr.bf16.mxu0 %v822_v16  ;;  %v43_v59 = vld [vmem:[#allocation2 + $0x8] sm:$0x3f]  ;;  %v850_v4 = vld [vmem:[#allocation5 + $0x110] sm:$0xff]   ;;  %v851_v5 = vld [vmem:[#allocation5 + $0x148] sm:$0xff]  }
  0x2a   :  { %753 = vmatpush3.bf16.msra.mxu1 %v821_v15  ;;  %528 = vmatprep.mubr.bf16.mxu0 %v87_v46  ;;  %v89_v51 = vpack.c.bf16 %v62_v47, %v62_v47  ;;  %v63_v60 = vcombine.high %v43_v59, %v43_v59  ;;  %v70_v61 = vrot.slane %v43_v59, %v52_v34  ;;  %v848_v62 = vld [vmem:[#allocation5 + $0x118] sm:$0xff]   ;;  %v852_v6 = vld [vmem:[#allocation5 + $0x108] sm:$0xff]   ;;  %v854_v7 = vld [vmem:[#allocation5 + $0x140] sm:$0xff]  }
  0x2b   :  { %754 = vmatprep.subr.bf16.mxu1 %v824_v18  ;;  %v855_v8 = vld [vmem:[#allocation5 + $0x100] sm:$0xff]   ;;  %v673_v23 = vld [vmem:[%s965_s2] ss:$0 sm:$0xff] }
  0x2c   :  { %733 = vmatpush3.bf16.msra.mxu0 %v823_v17  ;;  %568 = vmatprep.mubr.bf16.mxu1 %v89_v51  ;;  %v77_v63 = vrot.slane %v63_v60, %v52_v34  ;;  %v78_v0 = vcombine.high %v70_v61, %v70_v61  ;;  %v90_v9 = vpack.c.bf16 %v70_v61, %v70_v61 }
  0x2d   :  { %734 = vmatprep.subr.bf16.mxu0 %v826_v20 }
  0x2e   :  { %755 = vmatpush3.bf16.msra.mxu1 %v825_v19  ;;  %v92_v2 = vpack.c.bf16 %v77_v63, %v77_v63  ;;  %v91_v3 = vpack.c.bf16 %v78_v0, %v78_v0 }
  0x2f   :  { %756 = vmatprep.subr.bf16.mxu1 %v828_v25 }
  0x30   :  { %735 = vmatpush3.bf16.msra.mxu0 %v827_v24 }
  0x31   :  { %736 = vmatprep.subr.bf16.mxu0 %v830_v27 }
  0x32   :  { %757 = vmatpush3.bf16.msra.mxu1 %v829_v26 }
  0x33   :  { %758 = vmatprep.subr.bf16.mxu1 %v832_v31 }
  0x34   :  { %737 = vmatpush3.bf16.msra.mxu0 %v831_v30 }
  0x35   :  { %738 = vmatprep.subr.bf16.mxu0 %v834_v33 }
  0x36   :  { %759 = vmatpush3.bf16.msra.mxu1 %v833_v32 }
  0x37   :  { %760 = vmatprep.subr.bf16.mxu1 %v836_v36 }
  0x38   :  { %739 = vmatpush3.bf16.msra.mxu0 %v835_v35 }
  0x39   :  { %768 = vmatprep.subr.bf16.mxu0 %v838_v41 }
  0x3a   :  { %761 = vmatpush3.bf16.msra.mxu1 %v837_v39 }
  0x3b   :  { %792 = vmatprep.subr.bf16.mxu1 %v928_v45  ;;  %529 = vmatmul.mubr.bf16.vlgmr.msra.gmra.mxu0 %v86_v44 }
  0x3c   :  { %769 = vmatpush3.bf16.msra.mxu0 %v840_v48  ;;  %608 = vmatprep.mubr.bf16.mxu0 %v91_v3 }
  0x3d   :  { %569 = vmatmul.mubr.bf16.vlgmr.msra.gmra.mxu1 %v88_v49  ;;  %770 = vmatprep.subr.bf16.mxu0 %v841_v50 }
  0x3e   :  { %794 = vmatprep.mubr.msk.bf16.mxu1 %vm929_vm0, %v928_v45  ;;  %793 = vmatpush3.bf16.msra.mxu1 %v853_v56 }
  0x40   :  { %771 = vmatpush3.bf16.msra.mxu0 %v842_v52 }
  0x41   :  { %772 = vmatprep.subr.bf16.mxu0 %v843_v53 }
  0x44   :  { %773 = vmatpush3.bf16.msra.mxu0 %v844_v54 }
  0x45   :  { %774 = vmatprep.subr.bf16.mxu0 %v845_v55  ;;  %795 = vmatmul.mubr.msk.bf16.vlgmr.msra.gmra.mxu1 %vm492_vm1, %v92_v2 }
  0x48   :  { %775 = vmatpush3.bf16.msra.mxu0 %v846_v57 }
  0x49   :  { %776 = vmatprep.subr.bf16.mxu0 %v847_v58 }
  0x4c   :  { %777 = vmatpush3.bf16.msra.mxu0 %v848_v62 }
  0x4d   :  { %778 = vmatprep.subr.bf16.mxu0 %v849_v1 }
  0x50   :  { %779 = vmatpush3.bf16.msra.mxu0 %v850_v4 }
  0x51   :  { %780 = vmatprep.subr.bf16.mxu0 %v851_v5 }
  0x54   :  { %781 = vmatpush3.bf16.msra.mxu0 %v852_v6 }
  0x55   :  { %782 = vmatprep.subr.bf16.mxu0 %v854_v7 }
  0x58   :  { %783 = vmatpush3.bf16.msra.mxu0 %v855_v8 }
  0x5b   :  { %609 = vmatmul.mubr.bf16.vlgmr.msra.gmra.mxu0 %v90_v9 }
  0xfb   :  { %v740_v10 = vpop.f32.mrf.mxu0 }
  0xfd   :  { %v741_v11 = vpop.f32.mrf.mxu0  ;;  %v762_v12 = vpop.f32.mrf.mxu1 }
  0xfe   :  { %v742_v22 = vadd.f32 %v741_v11, %v740_v10 }
  0xff   :  { %v743_v13 = vpop.f32.mrf.mxu0  ;;  %v763_v14 = vpop.f32.mrf.mxu1 }
 0x100   :  { %v531_v24 = vadd.f32 %v742_v22, %v673_v23  ;;  %v764_v25 = vadd.f32 %v763_v14, %v762_v12 }
 0x101   :  { %v744_v15 = vpop.f32.mrf.mxu0  ;;  %v765_v16 = vpop.f32.mrf.mxu1 }
 0x102   :  { %v571_v28 = vadd.f32 %v764_v25, %v531_v24 }
 0x103   :  { %v766_v17 = vpop.f32.mrf.mxu1 }
 0x105   :  { %v650_v18 = vpop.f32.mrf.mxu1 }
 0x107   :  { %v796_v19 = vpop.f32.mrf.mxu1 }
 0x109   :  { %v653_v20 = vpop.f32.mrf.mxu1 }
 0x10b   :  { %v797_v21 = vpop.f32.mrf.mxu1 }
 0x11b   :  { %v784_v26 = vpop.f32.mrf.mxu0 }
 0x11d   :  { %v785_v27 = vpop.f32.mrf.mxu0 }
 0x11e   :  { %v786_v29 = vadd.f32 %v785_v27, %v784_v26 }
 0x11f   :  { %v787_v30 = vpop.f32.mrf.mxu0 }
 0x120   :  { %v611_v31 = vadd.f32 %v786_v29, %v571_v28 }
 0x121   :  { %v788_v32 = vpop.f32.mrf.mxu0 }
 0x122   :  { %v651_v33 = vadd.f32 %v650_v18, %v611_v31 }
 0x124   :  { %656 = vst [vmem:[#allocation7] sm:$0x3] %v651_v33 }
 0x125   :  { %908 = shalt.err (!%p905_p0)
}
 0x126   :  { %666 = dma.vmem_to_hbm [thread:$0]  %s664_s25, 32, %s966_s3, [#allocation4]  }
 0x127   :  { %921 = dma.done.wait [#allocation4], 32  }
 0x128   :  { %922 = vsyncadd [#allocation4], 4294967264 }
 0x129   :  { %670 = vsyncpa [#allocation3], 1 }
 0x12a   :  { %671 = vsyncpa [#allocation6], 1 }
 0x12b   :  { %672 = vsyncpa [#allocation4], 1 }

</bundles_post_ra>
